<compile_context>
chip_gen: v7x
topology: tpu7x:2x2x1
jax: 0.10.0
libtpu: 0.0.40
codegen_flags: <defaults>
</compile_context>

<pallas_src>
import functools

import jax
import jax.numpy as jnp
from jax import lax
from jax.experimental import pallas as pl
from jax.experimental.pallas import tpu as pltpu


# ---------------------------------------------------------------------------
# Fused kernel: BN1 -> ReLU -> conv1x1(+BN2 scale folded) -> +bias -> ReLU
#               -> 3x3 conv (padding=1) as 9 accumulated matmuls
#               -> in-kernel channel concat (x passthrough + new features).
# Per grid step: one image, channel-first (C, H*W) layout.
# ---------------------------------------------------------------------------
def _dense_layer_kernel(x_ref, s1_ref, b1_ref, w1_ref, b2_ref, w2_ref, o_ref,
                        ext_ref, *, H, W, PAD):
    # x_ref  : (Cin, H*W)          f32
    # s1/b1  : (Cin, 1)            f32   (BN1 folded scale / bias)
    # w1     : (Cmid, Cin)         bf16  (1x1 conv weight, BN2 scale folded in)
    # b2     : (Cmid, 1)           f32   (BN2 folded bias)
    # w2     : (9, G, Cmid)        bf16  (3x3 conv weight, tap-major)
    # o_ref  : (Cin + G, H*W)      f32   (x passthrough + new features)
    # ext_ref: (Cmid, PAD+HW+PAD)  bf16  VMEM scratch (halo buffer)
    Cin, HW = x_ref.shape
    Cmid = w1_ref.shape[0]
    G = w2_ref.shape[1]

    x = x_ref[...]                                            # (Cin, HW) f32

    # --- exact passthrough of the input channels (torch.cat([x, new], 1)) ---
    o_ref[:Cin, :] = x

    # --- BN1 -> ReLU (f32 math), cast to bf16 for the MXU -------------------
    t = jnp.maximum(x * s1_ref[...] + b1_ref[...], 0.0).astype(jnp.bfloat16)

    # --- 1x1 conv (BN2 scale already folded into w1) -> +bias -> ReLU -------
    z = jnp.dot(w1_ref[...], t, preferred_element_type=jnp.float32)  # (Cmid,HW)
    # bf16 BEFORE all halo / tap work (matches the reference cast point).
    mid = jnp.maximum(z + b2_ref[...], 0.0).astype(jnp.bfloat16)     # (Cmid,HW)

    # --- halo buffer: [zeros | mid | zeros] along the lane axis --------------
    # PAD >= W+1 guarantees every vertically out-of-range tap read lands in a
    # zero halo, so no vertical (dy) mask is needed.  PAD is a multiple of 128
    # so the halo stores are lane-aligned.
    ext_ref[:, :PAD] = jnp.zeros((Cmid, PAD), jnp.bfloat16)
    ext_ref[:, PAD:PAD + HW] = mid
    ext_ref[:, PAD + HW:] = jnp.zeros((Cmid, PAD), jnp.bfloat16)

    # --- hoisted horizontal (dx) column masks --------------------------------
    col = lax.broadcasted_iota(jnp.int32, (1, HW), 1)
    if (W & (W - 1)) == 0:                                    # power-of-two W
        col = jnp.bitwise_and(col, W - 1)
    else:
        col = col % W
    not_first_col = col > 0          # valid mask for dx = -1
    not_last_col = col < (W - 1)     # valid mask for dx = +1

    # --- 3x3 conv, padding=1: 9 accumulated (G,Cmid)@(Cmid,HW) matmuls -------
    acc = jnp.zeros((G, HW), jnp.float32)
    tap = 0
    for dy in (-1, 0, 1):
        for dx in (-1, 0, 1):
            start = PAD + dy * W + dx
            shifted = ext_ref[:, start:start + HW]            # (Cmid, HW) bf16
            if dx == -1:
                shifted = jnp.where(not_first_col, shifted,
                                    jnp.zeros_like(shifted))
            elif dx == 1:
                shifted = jnp.where(not_last_col, shifted,
                                    jnp.zeros_like(shifted))
            acc = acc + jnp.dot(w2_ref[tap], shifted,
                                preferred_element_type=jnp.float32)
            tap += 1

    o_ref[Cin:, :] = acc.astype(o_ref.dtype)                  # (G, HW)


def _fused_call(x_flat, s1c, b1c, w1f, b2c, w2t, *, H, W):
    # x_flat: (N, Cin, H*W) f32 ; returns (N, Cin+G, H*W) f32
    N, Cin, HW = x_flat.shape
    Cmid = w1f.shape[0]
    G = w2t.shape[1]

    PAD = ((W + 1 + 127) // 128) * 128       # lane-aligned halo, >= W+1
    assert PAD >= W + 1 and PAD % 128 == 0

    kernel = functools.partial(_dense_layer_kernel, H=H, W=W, PAD=PAD)
    return pl.pallas_call(
        kernel,
        out_shape=jax.ShapeDtypeStruct((N, Cin + G, HW), jnp.float32),
        grid_spec=pltpu.PrefetchScalarGridSpec(
            num_scalar_prefetch=0,
            grid=(N,),
            in_specs=[
                pl.BlockSpec((None, Cin, HW), lambda n: (n, 0, 0)),
                pl.BlockSpec((Cin, 1), lambda n: (0, 0)),
                pl.BlockSpec((Cin, 1), lambda n: (0, 0)),
                pl.BlockSpec((Cmid, Cin), lambda n: (0, 0)),
                pl.BlockSpec((Cmid, 1), lambda n: (0, 0)),
                pl.BlockSpec((9, G, Cmid), lambda n: (0, 0, 0)),
            ],
            out_specs=pl.BlockSpec((None, Cin + G, HW), lambda n: (n, 0, 0)),
            scratch_shapes=[pltpu.VMEM((Cmid, HW + 2 * PAD), jnp.bfloat16)],
        ),
        compiler_params=pltpu.CompilerParams(
            dimension_semantics=("parallel",)),
    )(x_flat, s1c, b1c, w1f, b2c, w2t)


# ---------------------------------------------------------------------------
# Parameters (torch layouts) and folding
# ---------------------------------------------------------------------------
def init_dense_layer_params(key, num_input_features, growth_rate, bn_size):
    cin = num_input_features
    cmid = bn_size * growth_rate
    g = growth_rate
    ks = jax.random.split(key, 10)
    return dict(
        # BN1 (eval-mode running stats + affine)
        gamma1=jax.random.uniform(ks[0], (cin,), jnp.float32, 0.5, 1.5),
        beta1=jax.random.normal(ks[1], (cin,), jnp.float32) * 0.1,
        mean1=jax.random.normal(ks[2], (cin,), jnp.float32) * 0.1,
        var1=jax.random.uniform(ks[3], (cin,), jnp.float32, 0.5, 1.5),
        # conv1: torch weight layout (Cmid, Cin, 1, 1)
        w1=jax.random.normal(ks[4], (cmid, cin, 1, 1), jnp.float32) * 0.1,
        # BN2
        gamma2=jax.random.uniform(ks[5], (cmid,), jnp.float32, 0.5, 1.5),
        beta2=jax.random.normal(ks[6], (cmid,), jnp.float32) * 0.1,
        mean2=jax.random.normal(ks[7], (cmid,), jnp.float32) * 0.1,
        var2=jax.random.uniform(ks[8], (cmid,), jnp.float32, 0.5, 1.5),
        # conv2: torch weight layout (G, Cmid, 3, 3)
        w2=jax.random.normal(ks[9], (g, cmid, 3, 3), jnp.float32) * 0.1,
    )


def _prepare_params(params, eps=1e-5):
    # BN (eval) folded to scale/bias; BN2 scale folded into the 1x1 weight.
    # NOTE: folding into the bf16 1x1 weight changes rounding vs. a literal
    # f32 torch _DenseLayer; acceptable for inference (the reference applies
    # the same fold so the comparison is apples-to-apples).
    s1 = params["gamma1"] / jnp.sqrt(params["var1"] + eps)
    b1 = params["beta1"] - params["mean1"] * s1
    s2 = params["gamma2"] / jnp.sqrt(params["var2"] + eps)
    b2 = params["beta2"] - params["mean2"] * s2

    w1 = params["w1"].reshape(params["w1"].shape[0], -1)        # (Cmid, Cin)
    w1f = (w1 * s2[:, None]).astype(jnp.bfloat16)               # exact fold

    w2 = params["w2"]                                           # (G, Cmid, 3, 3)
    g, cmid = w2.shape[0], w2.shape[1]
    w2_bf16 = w2.astype(jnp.bfloat16)
    # tap-major: (G, Cmid, 3, 3) -> (3, 3, G, Cmid) -> (9, G, Cmid)
    w2t = jnp.transpose(w2_bf16, (2, 3, 0, 1)).reshape(9, g, cmid)

    return dict(s1=s1, b1=b1, w1f=w1f, b2=b2, w2t=w2t, w2f=w2_bf16)


# ---------------------------------------------------------------------------
# Forward
# ---------------------------------------------------------------------------
@functools.partial(jax.jit, static_argnames=("drop_rate",))
def dense_layer_forward(x_nchw, params, drop_rate=0.0):
    """_DenseLayer forward.  x_nchw: (N, Cin, H, W) f32 -> (N, Cin+G, H, W)."""
    N, Cin, H, W = x_nchw.shape
    p = _prepare_params(params)
    G = p["w2t"].shape[1]

    x_flat = x_nchw.reshape(N, Cin, H * W)                      # free reshape
    out_flat = _fused_call(x_flat,
                           p["s1"][:, None], p["b1"][:, None],
                           p["w1f"], p["b2"][:, None], p["w2t"],
                           H=H, W=W)
    # drop_rate == 0 / eval-mode dropout is identity.
    # TODO(synk): training-mode dropout not implemented.
    return out_flat.reshape(N, Cin + G, H, W)                   # free reshape


# ---------------------------------------------------------------------------
# Reference (independent spatial path via lax.conv; same bf16 cast points)
# ---------------------------------------------------------------------------
def _reference(x_nchw, params, eps=1e-5):
    p = _prepare_params(params, eps)
    s1 = p["s1"].reshape(1, -1, 1, 1)
    b1 = p["b1"].reshape(1, -1, 1, 1)
    b2 = p["b2"].reshape(1, -1, 1, 1)

    t = jnp.maximum(x_nchw * s1 + b1, 0.0).astype(jnp.bfloat16)
    z = lax.conv_general_dilated(
        t, p["w1f"][:, :, None, None], (1, 1), "VALID",
        dimension_numbers=("NCHW", "OIHW", "NCHW"),
        preferred_element_type=jnp.float32)
    mid = jnp.maximum(z + b2, 0.0).astype(jnp.bfloat16)
    new = lax.conv_general_dilated(
        mid, p["w2f"], (1, 1), ((1, 1), (1, 1)),
        dimension_numbers=("NCHW", "OIHW", "NCHW"),
        preferred_element_type=jnp.float32)
    return jnp.concatenate([x_nchw, new], axis=1)


if __name__ == "__main__":
    # Small DenseNet-style configuration.
    num_input_features = 16
    growth_rate = 8
    bn_size = 4
    drop_rate = 0.0
    N, H, W = 2, 16, 16

    key = jax.random.PRNGKey(0)
    kx, kp = jax.random.split(key)
    x = jax.random.normal(kx, (N, num_input_features, H, W), jnp.float32)
    params = init_dense_layer_params(kp, num_input_features, growth_rate, bn_size)

    out = dense_layer_forward(x, params, drop_rate=drop_rate)
    out = jax.block_until_ready(out)

    assert out.shape == (N, num_input_features + growth_rate, H, W), out.shape
    ref = _reference(x, params)
    max_err = float(jnp.max(jnp.abs(out - ref)))
    assert jnp.allclose(out, ref, rtol=5e-3, atol=5e-3), max_err
    # Passthrough channels must be bit-exact.
    assert bool(jnp.all(out[:, :num_input_features] == x))

    print("KERNEL_OK")
</pallas_src>

<mosaic_0001>
module attributes {stable_mosaic.version = 11 : i64} {
  func.func @_dense_layer_kernel(%arg0: i32, %arg1: memref<1x16x256xf32, #tpu.memory_space<vmem>>, %arg2: memref<16x1xf32, #tpu.memory_space<vmem>>, %arg3: memref<16x1xf32, #tpu.memory_space<vmem>>, %arg4: memref<32x16xbf16, #tpu.memory_space<vmem>>, %arg5: memref<32x1xf32, #tpu.memory_space<vmem>>, %arg6: memref<9x8x32xbf16, #tpu.memory_space<vmem>>, %arg7: memref<1x24x256xf32, #tpu.memory_space<vmem>>, %arg8: memref<32x512xbf16, #tpu.memory_space<vmem>>) attributes {dimension_semantics = [#tpu.dimension_semantics<parallel>], iteration_bounds = array<i64: 2>, scalar_prefetch = 0 : i64, scratch_operands = 1 : i64, tpu.core_type = #tpu.core_type<tc>, window_params = [{transform_indices = @transform_0, window_bounds = array<i64: 1, 16, 256>}, {pipeline_mode = #tpu.pipeline_mode<synchronous>, transform_indices = @transform_1, window_bounds = array<i64: 16, 1>}, {pipeline_mode = #tpu.pipeline_mode<synchronous>, transform_indices = @transform_2, window_bounds = array<i64: 16, 1>}, {pipeline_mode = #tpu.pipeline_mode<synchronous>, transform_indices = @transform_3, window_bounds = array<i64: 32, 16>}, {pipeline_mode = #tpu.pipeline_mode<synchronous>, transform_indices = @transform_4, window_bounds = array<i64: 32, 1>}, {pipeline_mode = #tpu.pipeline_mode<synchronous>, transform_indices = @transform_5, window_bounds = array<i64: 9, 8, 32>}, {transform_indices = @transform_6, window_bounds = array<i64: 1, 24, 256>}]} {
    %c0 = arith.constant 0 : index
    %c0_0 = arith.constant 0 : index
    %c0_1 = arith.constant 0 : index
    %0 = vector.load %arg1[%c0, %c0_0, %c0_1] : memref<1x16x256xf32, #tpu.memory_space<vmem>>, vector<1x16x256xf32>
    %1 = vector.shape_cast %0 : vector<1x16x256xf32> to vector<16x256xf32>
    %c0_2 = arith.constant 0 : index
    %c0_3 = arith.constant 0 : index
    %c0_4 = arith.constant 0 : index
    %2 = vector.load %arg7[%c0_2, %c0_3, %c0_4] : memref<1x24x256xf32, #tpu.memory_space<vmem>>, vector<1x16x256xf32>
    %3 = vector.shape_cast %2 : vector<1x16x256xf32> to vector<16x256xf32>
    %4 = vector.shape_cast %1 : vector<16x256xf32> to vector<1x16x256xf32>
    tpu.vector_store %arg7[%c0_2, %c0_3, %c0_4], %4 {strides = array<i32>} : memref<1x24x256xf32, #tpu.memory_space<vmem>>, vector<1x16x256xf32>,
    %c0_5 = arith.constant 0 : index
    %c0_6 = arith.constant 0 : index
    %5 = vector.load %arg2[%c0_5, %c0_6] : memref<16x1xf32, #tpu.memory_space<vmem>>, vector<16x1xf32>
    %6 = vector.broadcast %5 : vector<16x1xf32> to vector<16x256xf32>
    %7 = arith.mulf %1, %6 : vector<16x256xf32>
    %c0_7 = arith.constant 0 : index
    %c0_8 = arith.constant 0 : index
    %8 = vector.load %arg3[%c0_7, %c0_8] : memref<16x1xf32, #tpu.memory_space<vmem>>, vector<16x1xf32>
    %9 = vector.broadcast %8 : vector<16x1xf32> to vector<16x256xf32>
    %10 = arith.addf %7, %9 : vector<16x256xf32>
    %cst = arith.constant 0.000000e+00 : f32
    %11 = vector.broadcast %cst : f32 to vector<16x256xf32>
    %12 = arith.maximumf %10, %11 : vector<16x256xf32>
    %13 = arith.truncf %12 : vector<16x256xf32> to vector<16x256xbf16>
    %c0_9 = arith.constant 0 : index
    %c0_10 = arith.constant 0 : index
    %14 = vector.load %arg4[%c0_9, %c0_10] : memref<32x16xbf16, #tpu.memory_space<vmem>>, vector<32x16xbf16>
    %cst_11 = arith.constant dense<0.000000e+00> : vector<32x256xf32>
    %15 = tpu.matmul %14, %13, %cst_11 {dimension_numbers = #tpu.dot_dimension_numbers<[1], [0], [0], [1], [0, 0, 1, 1], [], []>} : vector<32x16xbf16>, vector<16x256xbf16>, vector<32x256xf32> -> vector<32x256xf32>
    %c0_12 = arith.constant 0 : index
    %c0_13 = arith.constant 0 : index
    %16 = vector.load %arg5[%c0_12, %c0_13] : memref<32x1xf32, #tpu.memory_space<vmem>>, vector<32x1xf32>
    %17 = vector.broadcast %16 : vector<32x1xf32> to vector<32x256xf32>
    %18 = arith.addf %15, %17 : vector<32x256xf32>
    %cst_14 = arith.constant 0.000000e+00 : f32
    %19 = vector.broadcast %cst_14 : f32 to vector<32x256xf32>
    %20 = arith.maximumf %18, %19 : vector<32x256xf32>
    %21 = arith.truncf %20 : vector<32x256xf32> to vector<32x256xbf16>
    %cst_15 = arith.constant 0.000000e+00 : bf16
    %22 = vector.broadcast %cst_15 : bf16 to vector<32x128xbf16>
    %c0_16 = arith.constant 0 : index
    %c0_17 = arith.constant 0 : index
    %23 = vector.load %arg8[%c0_16, %c0_17] : memref<32x512xbf16, #tpu.memory_space<vmem>>, vector<32x128xbf16>
    tpu.vector_store %arg8[%c0_16, %c0_17], %22 {strides = array<i32>} : memref<32x512xbf16, #tpu.memory_space<vmem>>, vector<32x128xbf16>,
    %c0_18 = arith.constant 0 : index
    %c128 = arith.constant 128 : index
    %24 = vector.load %arg8[%c0_18, %c128] : memref<32x512xbf16, #tpu.memory_space<vmem>>, vector<32x256xbf16>
    tpu.vector_store %arg8[%c0_18, %c128], %21 {strides = array<i32>} : memref<32x512xbf16, #tpu.memory_space<vmem>>, vector<32x256xbf16>,
    %cst_19 = arith.constant 0.000000e+00 : bf16
    %25 = vector.broadcast %cst_19 : bf16 to vector<32x128xbf16>
    %c0_20 = arith.constant 0 : index
    %c384 = arith.constant 384 : index
    %26 = vector.load %arg8[%c0_20, %c384] : memref<32x512xbf16, #tpu.memory_space<vmem>>, vector<32x128xbf16>
    tpu.vector_store %arg8[%c0_20, %c384], %25 {strides = array<i32>} : memref<32x512xbf16, #tpu.memory_space<vmem>>, vector<32x128xbf16>,
    %27 = tpu.iota {dimensions = array<i32: 1>} : vector<1x256xi32>
    %c15_i32 = arith.constant 15 : i32
    %28 = vector.broadcast %c15_i32 : i32 to vector<1x256xi32>
    %29 = arith.andi %27, %28 : vector<1x256xi32>
    %c0_i32 = arith.constant 0 : i32
    %30 = vector.broadcast %c0_i32 : i32 to vector<1x256xi32>
    %31 = arith.cmpi sgt, %29, %30 : vector<1x256xi32>
    %c15_i32_21 = arith.constant 15 : i32
    %32 = vector.broadcast %c15_i32_21 : i32 to vector<1x256xi32>
    %33 = arith.cmpi slt, %29, %32 : vector<1x256xi32>
    %cst_22 = arith.constant 0.000000e+00 : f32
    %34 = vector.broadcast %cst_22 : f32 to vector<8x256xf32>
    %c0_23 = arith.constant 0 : index
    %c111 = arith.constant 111 : index
    %35 = vector.load %arg8[%c0_23, %c111] : memref<32x512xbf16, #tpu.memory_space<vmem>>, vector<32x256xbf16>
    %cst_24 = arith.constant 0.000000e+00 : bf16
    %36 = vector.broadcast %cst_24 : bf16 to vector<32x256xbf16>
    %37 = vector.shape_cast %31 : vector<1x256xi1> to vector<1x256xi1>
    %38 = vector.broadcast %37 : vector<1x256xi1> to vector<32x256xi1>
    %39 = arith.select %38, %35, %36 : vector<32x256xi1>, vector<32x256xbf16>
    %c0_25 = arith.constant 0 : index
    %c0_26 = arith.constant 0 : index
    %c0_27 = arith.constant 0 : index
    %40 = vector.load %arg6[%c0_25, %c0_26, %c0_27] : memref<9x8x32xbf16, #tpu.memory_space<vmem>>, vector<1x8x32xbf16>
    %41 = vector.shape_cast %40 : vector<1x8x32xbf16> to vector<8x32xbf16>
    %cst_28 = arith.constant dense<0.000000e+00> : vector<8x256xf32>
    %42 = tpu.matmul %41, %39, %cst_28 {dimension_numbers = #tpu.dot_dimension_numbers<[1], [0], [0], [1], [0, 0, 1, 1], [], []>} : vector<8x32xbf16>, vector<32x256xbf16>, vector<8x256xf32> -> vector<8x256xf32>
    %43 = arith.addf %34, %42 : vector<8x256xf32>
    %c0_29 = arith.constant 0 : index
    %c112 = arith.constant 112 : index
    %44 = vector.load %arg8[%c0_29, %c112] : memref<32x512xbf16, #tpu.memory_space<vmem>>, vector<32x256xbf16>
    %c1 = arith.constant 1 : index
    %c0_30 = arith.constant 0 : index
    %c0_31 = arith.constant 0 : index
    %45 = vector.load %arg6[%c1, %c0_30, %c0_31] : memref<9x8x32xbf16, #tpu.memory_space<vmem>>, vector<1x8x32xbf16>
    %46 = vector.shape_cast %45 : vector<1x8x32xbf16> to vector<8x32xbf16>
    %cst_32 = arith.constant dense<0.000000e+00> : vector<8x256xf32>
    %47 = tpu.matmul %46, %44, %cst_32 {dimension_numbers = #tpu.dot_dimension_numbers<[1], [0], [0], [1], [0, 0, 1, 1], [], []>} : vector<8x32xbf16>, vector<32x256xbf16>, vector<8x256xf32> -> vector<8x256xf32>
    %48 = arith.addf %43, %47 : vector<8x256xf32>
    %c0_33 = arith.constant 0 : index
    %c113 = arith.constant 113 : index
    %49 = vector.load %arg8[%c0_33, %c113] : memref<32x512xbf16, #tpu.memory_space<vmem>>, vector<32x256xbf16>
    %cst_34 = arith.constant 0.000000e+00 : bf16
    %50 = vector.broadcast %cst_34 : bf16 to vector<32x256xbf16>
    %51 = vector.shape_cast %33 : vector<1x256xi1> to vector<1x256xi1>
    %52 = vector.broadcast %51 : vector<1x256xi1> to vector<32x256xi1>
    %53 = arith.select %52, %49, %50 : vector<32x256xi1>, vector<32x256xbf16>
    %c2 = arith.constant 2 : index
    %c0_35 = arith.constant 0 : index
    %c0_36 = arith.constant 0 : index
    %54 = vector.load %arg6[%c2, %c0_35, %c0_36] : memref<9x8x32xbf16, #tpu.memory_space<vmem>>, vector<1x8x32xbf16>
    %55 = vector.shape_cast %54 : vector<1x8x32xbf16> to vector<8x32xbf16>
    %cst_37 = arith.constant dense<0.000000e+00> : vector<8x256xf32>
    %56 = tpu.matmul %55, %53, %cst_37 {dimension_numbers = #tpu.dot_dimension_numbers<[1], [0], [0], [1], [0, 0, 1, 1], [], []>} : vector<8x32xbf16>, vector<32x256xbf16>, vector<8x256xf32> -> vector<8x256xf32>
    %57 = arith.addf %48, %56 : vector<8x256xf32>
    %c0_38 = arith.constant 0 : index
    %c127 = arith.constant 127 : index
    %58 = vector.load %arg8[%c0_38, %c127] : memref<32x512xbf16, #tpu.memory_space<vmem>>, vector<32x256xbf16>
    %cst_39 = arith.constant 0.000000e+00 : bf16
    %59 = vector.broadcast %cst_39 : bf16 to vector<32x256xbf16>
    %60 = vector.shape_cast %31 : vector<1x256xi1> to vector<1x256xi1>
    %61 = vector.broadcast %60 : vector<1x256xi1> to vector<32x256xi1>
    %62 = arith.select %61, %58, %59 : vector<32x256xi1>, vector<32x256xbf16>
    %c3 = arith.constant 3 : index
    %c0_40 = arith.constant 0 : index
    %c0_41 = arith.constant 0 : index
    %63 = vector.load %arg6[%c3, %c0_40, %c0_41] : memref<9x8x32xbf16, #tpu.memory_space<vmem>>, vector<1x8x32xbf16>
    %64 = vector.shape_cast %63 : vector<1x8x32xbf16> to vector<8x32xbf16>
    %cst_42 = arith.constant dense<0.000000e+00> : vector<8x256xf32>
    %65 = tpu.matmul %64, %62, %cst_42 {dimension_numbers = #tpu.dot_dimension_numbers<[1], [0], [0], [1], [0, 0, 1, 1], [], []>} : vector<8x32xbf16>, vector<32x256xbf16>, vector<8x256xf32> -> vector<8x256xf32>
    %66 = arith.addf %57, %65 : vector<8x256xf32>
    %c0_43 = arith.constant 0 : index
    %c128_44 = arith.constant 128 : index
    %67 = vector.load %arg8[%c0_43, %c128_44] : memref<32x512xbf16, #tpu.memory_space<vmem>>, vector<32x256xbf16>
    %c4 = arith.constant 4 : index
    %c0_45 = arith.constant 0 : index
    %c0_46 = arith.constant 0 : index
    %68 = vector.load %arg6[%c4, %c0_45, %c0_46] : memref<9x8x32xbf16, #tpu.memory_space<vmem>>, vector<1x8x32xbf16>
    %69 = vector.shape_cast %68 : vector<1x8x32xbf16> to vector<8x32xbf16>
    %cst_47 = arith.constant dense<0.000000e+00> : vector<8x256xf32>
    %70 = tpu.matmul %69, %67, %cst_47 {dimension_numbers = #tpu.dot_dimension_numbers<[1], [0], [0], [1], [0, 0, 1, 1], [], []>} : vector<8x32xbf16>, vector<32x256xbf16>, vector<8x256xf32> -> vector<8x256xf32>
    %71 = arith.addf %66, %70 : vector<8x256xf32>
    %c0_48 = arith.constant 0 : index
    %c129 = arith.constant 129 : index
    %72 = vector.load %arg8[%c0_48, %c129] : memref<32x512xbf16, #tpu.memory_space<vmem>>, vector<32x256xbf16>
    %cst_49 = arith.constant 0.000000e+00 : bf16
    %73 = vector.broadcast %cst_49 : bf16 to vector<32x256xbf16>
    %74 = vector.shape_cast %33 : vector<1x256xi1> to vector<1x256xi1>
    %75 = vector.broadcast %74 : vector<1x256xi1> to vector<32x256xi1>
    %76 = arith.select %75, %72, %73 : vector<32x256xi1>, vector<32x256xbf16>
    %c5 = arith.constant 5 : index
    %c0_50 = arith.constant 0 : index
    %c0_51 = arith.constant 0 : index
    %77 = vector.load %arg6[%c5, %c0_50, %c0_51] : memref<9x8x32xbf16, #tpu.memory_space<vmem>>, vector<1x8x32xbf16>
    %78 = vector.shape_cast %77 : vector<1x8x32xbf16> to vector<8x32xbf16>
    %cst_52 = arith.constant dense<0.000000e+00> : vector<8x256xf32>
    %79 = tpu.matmul %78, %76, %cst_52 {dimension_numbers = #tpu.dot_dimension_numbers<[1], [0], [0], [1], [0, 0, 1, 1], [], []>} : vector<8x32xbf16>, vector<32x256xbf16>, vector<8x256xf32> -> vector<8x256xf32>
    %80 = arith.addf %71, %79 : vector<8x256xf32>
    %c0_53 = arith.constant 0 : index
    %c143 = arith.constant 143 : index
    %81 = vector.load %arg8[%c0_53, %c143] : memref<32x512xbf16, #tpu.memory_space<vmem>>, vector<32x256xbf16>
    %cst_54 = arith.constant 0.000000e+00 : bf16
    %82 = vector.broadcast %cst_54 : bf16 to vector<32x256xbf16>
    %83 = vector.shape_cast %31 : vector<1x256xi1> to vector<1x256xi1>
    %84 = vector.broadcast %83 : vector<1x256xi1> to vector<32x256xi1>
    %85 = arith.select %84, %81, %82 : vector<32x256xi1>, vector<32x256xbf16>
    %c6 = arith.constant 6 : index
    %c0_55 = arith.constant 0 : index
    %c0_56 = arith.constant 0 : index
    %86 = vector.load %arg6[%c6, %c0_55, %c0_56] : memref<9x8x32xbf16, #tpu.memory_space<vmem>>, vector<1x8x32xbf16>
    %87 = vector.shape_cast %86 : vector<1x8x32xbf16> to vector<8x32xbf16>
    %cst_57 = arith.constant dense<0.000000e+00> : vector<8x256xf32>
    %88 = tpu.matmul %87, %85, %cst_57 {dimension_numbers = #tpu.dot_dimension_numbers<[1], [0], [0], [1], [0, 0, 1, 1], [], []>} : vector<8x32xbf16>, vector<32x256xbf16>, vector<8x256xf32> -> vector<8x256xf32>
    %89 = arith.addf %80, %88 : vector<8x256xf32>
    %c0_58 = arith.constant 0 : index
    %c144 = arith.constant 144 : index
    %90 = vector.load %arg8[%c0_58, %c144] : memref<32x512xbf16, #tpu.memory_space<vmem>>, vector<32x256xbf16>
    %c7 = arith.constant 7 : index
    %c0_59 = arith.constant 0 : index
    %c0_60 = arith.constant 0 : index
    %91 = vector.load %arg6[%c7, %c0_59, %c0_60] : memref<9x8x32xbf16, #tpu.memory_space<vmem>>, vector<1x8x32xbf16>
    %92 = vector.shape_cast %91 : vector<1x8x32xbf16> to vector<8x32xbf16>
    %cst_61 = arith.constant dense<0.000000e+00> : vector<8x256xf32>
    %93 = tpu.matmul %92, %90, %cst_61 {dimension_numbers = #tpu.dot_dimension_numbers<[1], [0], [0], [1], [0, 0, 1, 1], [], []>} : vector<8x32xbf16>, vector<32x256xbf16>, vector<8x256xf32> -> vector<8x256xf32>
    %94 = arith.addf %89, %93 : vector<8x256xf32>
    %c0_62 = arith.constant 0 : index
    %c145 = arith.constant 145 : index
    %95 = vector.load %arg8[%c0_62, %c145] : memref<32x512xbf16, #tpu.memory_space<vmem>>, vector<32x256xbf16>
    %cst_63 = arith.constant 0.000000e+00 : bf16
    %96 = vector.broadcast %cst_63 : bf16 to vector<32x256xbf16>
    %97 = vector.shape_cast %33 : vector<1x256xi1> to vector<1x256xi1>
    %98 = vector.broadcast %97 : vector<1x256xi1> to vector<32x256xi1>
    %99 = arith.select %98, %95, %96 : vector<32x256xi1>, vector<32x256xbf16>
    %c8 = arith.constant 8 : index
    %c0_64 = arith.constant 0 : index
    %c0_65 = arith.constant 0 : index
    %100 = vector.load %arg6[%c8, %c0_64, %c0_65] : memref<9x8x32xbf16, #tpu.memory_space<vmem>>, vector<1x8x32xbf16>
    %101 = vector.shape_cast %100 : vector<1x8x32xbf16> to vector<8x32xbf16>
    %cst_66 = arith.constant dense<0.000000e+00> : vector<8x256xf32>
    %102 = tpu.matmul %101, %99, %cst_66 {dimension_numbers = #tpu.dot_dimension_numbers<[1], [0], [0], [1], [0, 0, 1, 1], [], []>} : vector<8x32xbf16>, vector<32x256xbf16>, vector<8x256xf32> -> vector<8x256xf32>
    %103 = arith.addf %94, %102 : vector<8x256xf32>
    %c0_67 = arith.constant 0 : index
    %c16 = arith.constant 16 : index
    %c0_68 = arith.constant 0 : index
    %104 = vector.load %arg7[%c0_67, %c16, %c0_68] : memref<1x24x256xf32, #tpu.memory_space<vmem>>, vector<1x8x256xf32>
    %105 = vector.shape_cast %104 : vector<1x8x256xf32> to vector<8x256xf32>
    %106 = vector.shape_cast %103 : vector<8x256xf32> to vector<1x8x256xf32>
    tpu.vector_store %arg7[%c0_67, %c16, %c0_68], %106 {strides = array<i32>} : memref<1x24x256xf32, #tpu.memory_space<vmem>>, vector<1x8x256xf32>,
    return
  }
  func.func @transform_0(%arg0: i32) -> (i32, i32, i32) {
    %c0_i32 = arith.constant 0 : i32
    %c0_i32_0 = arith.constant 0 : i32
    %c0_i32_1 = arith.constant 0 : i32
    return %arg0, %c0_i32, %c0_i32_0 : i32, i32, i32
  }
  func.func @transform_1(%arg0: i32) -> (i32, i32) {
    %c0_i32 = arith.constant 0 : i32
    %c0_i32_0 = arith.constant 0 : i32
    %c0_i32_1 = arith.constant 0 : i32
    return %c0_i32, %c0_i32_0 : i32, i32
  }
  func.func @transform_2(%arg0: i32) -> (i32, i32) {
    %c0_i32 = arith.constant 0 : i32
    %c0_i32_0 = arith.constant 0 : i32
    %c0_i32_1 = arith.constant 0 : i32
    return %c0_i32, %c0_i32_0 : i32, i32
  }
  func.func @transform_3(%arg0: i32) -> (i32, i32) {
    %c0_i32 = arith.constant 0 : i32
    %c0_i32_0 = arith.constant 0 : i32
    %c0_i32_1 = arith.constant 0 : i32
    return %c0_i32, %c0_i32_0 : i32, i32
  }
  func.func @transform_4(%arg0: i32) -> (i32, i32) {
    %c0_i32 = arith.constant 0 : i32
    %c0_i32_0 = arith.constant 0 : i32
    %c0_i32_1 = arith.constant 0 : i32
    return %c0_i32, %c0_i32_0 : i32, i32
  }
  func.func @transform_5(%arg0: i32) -> (i32, i32, i32) {
    %c0_i32 = arith.constant 0 : i32
    %c0_i32_0 = arith.constant 0 : i32
    %c0_i32_1 = arith.constant 0 : i32
    %c0_i32_2 = arith.constant 0 : i32
    return %c0_i32, %c0_i32_0, %c0_i32_1 : i32, i32, i32
  }
  func.func @transform_6(%arg0: i32) -> (i32, i32, i32) {
    %c0_i32 = arith.constant 0 : i32
    %c0_i32_0 = arith.constant 0 : i32
    %c0_i32_1 = arith.constant 0 : i32
    return %arg0, %c0_i32, %c0_i32_0 : i32, i32, i32
  }
}

</mosaic_0001>

<bundles_post_ra>
// kernel: dense_layer_forward.1
= control target key start
LH: loop header
LB: loop body
LE: loop exit
PB: predicated region body
PF: predicated region fallthrough
CT: control target
= control target key end

     0   :  { %s1424_s21 = smov 0   ;;  %s1745_s0 = inlined_call_operand.vmem [shape: f32[2,16,256], index: 0, kind: input, shape index: {}]   ;;  %s1746_s1 = inlined_call_operand.vmem [shape: f32[16,1], index: 1, kind: input, shape index: {}]   ;;  %s1747_s2 = inlined_call_operand.vmem [shape: f32[16,1], index: 2, kind: input, shape index: {}]   ;;  %s1748_s3 = inlined_call_operand.vmem [shape: bf16[32,16], index: 3, kind: input, shape index: {}]   ;;  %s1749_s4 = inlined_call_operand.vmem [shape: f32[32,1], index: 4, kind: input, shape index: {}]   ;;  %s1750_s5 = inlined_call_operand.vmem [shape: bf16[9,8,32], index: 5, kind: input, shape index: {}]   ;;  %s1751_s6 = inlined_call_operand.vmem [shape: f32[2,24,256], index: 6, kind: output, shape index: {}]  }
   0x1 LB: > { %s1253_s22 = sadd.s32 4294967295, %s1378_s21   ;;  %p1257_p0 = scmp.ge.s32.totalorder %s1378_s21, 1  ;;  %s1378_s21 = sphi %s1424_s21, %s16_s21  }
   0x2   : > { %p212_p1 = scmp.lt.s32.totalorder %s1378_s21, 3 }
   0x4   : > { %p213_p2 = pnand %p1257_p0, %p212_p1 }
   0x5   : > { %v279_v0 = vld [vmem:[%s1747_s2] sm:$0xff] (!%p213_p2)  ;;  %p242_p3 = scmp.lt.s32.totalorder (!%p213_p2), %s1253_s22, 1  ;;  %v1380_v2 = vmov (!%p213_p2), 0   ;;  %v280_v3 = vld [vmem:[%s1747_s2 + $0x8] sm:$0xff] (!%p213_p2)  ;;  %v308_v11 = vld [vmem:[%s1749_s4 + $0x18] sm:$0xff] (!%p213_p2)  ;;  %v419_v13 = vlaneseq (!%p213_p2)  ;;  %s1381_s24 = smov (!%p213_p2), 1  }
   0x6   : > { %216 = sbr.rel (%p213_p2) target bundleno = 778 (0x30a), region = 44  ;;  %v263_v1 = vld [vmem:[%s1746_s1] sm:$0xff] (!%p213_p2)  ;;  %1334 = vset.pattern.permute.xlu1 (!%p213_p2), %v1380_v2  ;;  %1333 = vset.pattern.permute.xlu0 (!%p213_p2), %v1380_v2  ;;  %v264_v4 = vld [vmem:[%s1746_s1 + $0x8] sm:$0xff] (!%p213_p2)  ;;  %v307_v12 = vld [vmem:[%s1749_s4 + $0x10] sm:$0xff] (!%p213_p2)  ;;  %s1382_s25 = smov (!%p213_p2), 111   ;;  %vm339_vm6 = vcmask (!%p213_p2), 130048  }
   0x7   : > { %283 = vperm.xlu1 (!%p213_p2), %1334, %v279_v0   ;;  %267 = vperm.xlu0 (!%p213_p2), %1333, %v263_v1   ;;  %v306_v8 = vld [vmem:[%s1749_s4 + $0x8] sm:$0xff] (!%p213_p2)  ;;  %v305_v9 = vld [vmem:[%s1749_s4] sm:$0xff] (!%p213_p2)  ;;  %v420_v14 = vand.u32 (!%p213_p2), 127, %v419_v13  ;;  %v441_v15 = vshrl.u32 (!%p213_p2), %v419_v13, 7  ;;  %s1383_s26 = smov (!%p213_p2), 15   ;;  %s1384_s27 = smov (!%p213_p2), 113  }
   0x8   : > { %378 = vmatprep.mubr.bf16.mxu0 (!%p213_p2), %v1380_v2  ;;  %840 = vmatprep.mubr.bf16.mxu1 (!%p213_p2), %v1380_v2  ;;  %s1385_s28 = smov (!%p213_p2), 127   ;;  %s1386_s29 = smov (!%p213_p2), 17   ;;  %v1370_v45 = vld [vmem:[%s1748_s3] sm:$0xff] (!%p213_p2)   ;;  %v1371_v46 = vld [vmem:[%s1748_s3 + $0x8] sm:$0xff] (!%p213_p2)   ;;  %vm452_vm7 = vcmask (!%p213_p2), 908288   ;;  %vm627_vm8 = vcmask (!%p213_p2), 924672  }
   0x9   : > { %v421_v16 = vadd.s32 (!%p213_p2), 128, %v420_v14  ;;  %v422_v17 = vand.u32 (!%p213_p2), 15, %v420_v14  ;;  %v446_v19 = vsub.s32 (!%p213_p2), 4, %v441_v15  ;;  %v442_v20 = vsub.s32 (!%p213_p2), 0, %v441_v15  ;;  %s1387_s10 = smov (!%p213_p2), 16  }
   0xa   : > { %vm748_vm13 = vcmask (!%p213_p2), 7168   ;;  %vm658_vm14 = vcmask (!%p213_p2), 121856   ;;  %vm493_vm15 = vcmask (!%p213_p2), 261120  }
   0xb   : > { %288 = vperm.xlu1 (!%p213_p2), %1334, %v280_v3   ;;  %272 = vperm.xlu0 (!%p213_p2), %1333, %v264_v4   ;;  %v423_v18 = vand.u32 (!%p213_p2), 15, %v421_v16  ;;  %vm426_vm0 = vcmp.lt.s32.totalorder (!%p213_p2), %v422_v17, 15  ;;  %vm424_vm1 = vcmp.gt.s32.totalorder (!%p213_p2), %v422_v17, 0 }
   0xd   : > { %s1753_s22 = smov (!%p242_p3, %s1253_s22), 1  ;;  %vm427_vm2 = vcmp.lt.s32.totalorder %v423_v18, 15  ;;  %vm425_vm3 = vcmp.gt.s32.totalorder %v423_v18, 0 }
   0xe   : > { %s1284_s7 = sshll.u32 %s1753_s22, 5  ;;  %s1315_s8 = smul.u32 48, %s1753_s22  ;;  %vm613_vm4 = vmpackc.low %vm427_vm2, %vm426_vm0 }
   0xf   : > { %s246_s11 = scalar_lea.vmem %s1745_s0, %s1284_s7  ;;  %316 = vperm.xlu1 %1334, %v306_v8   ;;  %311 = vperm.xlu0 %1333, %v305_v9   ;;  %v614_v21 = vsel %vm613_vm4, 65537, %v1380_v2  ;;  %vm438_vm5 = vmpackc.low %vm425_vm3, %vm424_vm1 }
  0x10   : > { %s1454_s14 = scalar_lea.vmem %s1751_s6, %s1315_s8  ;;  %v255_v5 = vld [vmem:[%s246_s11] sm:$0xff]  ;;  %v256_v6 = vld [vmem:[%s246_s11 + $0x8] sm:$0xff]  ;;  %v257_v7 = vld [vmem:[%s246_s11 + $0x10] sm:$0xff]  ;;  %v622_v22 = vrot.slane %v614_v21, %v446_v19  ;;  %v618_v23 = vrot.slane %v614_v21, %v442_v20  ;;  %v439_v24 = vsel %vm438_vm5, 65537, %v1380_v2  ;;  %vm717_vm5 = vcmask 1039360  }
  0x11   : > { %259 = vst [vmem:[%s1454_s14] sm:$0xff] %v255_v5  ;;  %260 = vst [vmem:[%s1454_s14 + $0x8] sm:$0xff] %v256_v6  ;;  %v258_v10 = vld [vmem:[%s246_s11 + $0x18] sm:$0xff]  ;;  %v447_v25 = vrot.slane %v439_v24, %v446_v19  ;;  %v443_v26 = vrot.slane %v439_v24, %v442_v20  ;;  %s1388_s11 = smov 112  }
  0x12   : > { %261 = vst [vmem:[%s1454_s14 + $0x10] sm:$0xff] %v257_v7  ;;  %262 = vst [vmem:[%s1454_s14 + $0x18] sm:$0xff] %v258_v10 }
  0x13   : > { %326 = vperm.xlu1 %1334, %v308_v11   ;;  %321 = vperm.xlu0 %1333, %v307_v12  }
  0x17   : > { %859 = vrot.lane.b32.xlu1 %v622_v22, %s1381_s24  ;;  %857 = vrot.lane.b32.xlu0 %v618_v23, %s1381_s24 }
  0x1b   : > { %450 = vrot.lane.b32.xlu1 %v447_v25, %s1382_s25  ;;  %448 = vrot.lane.b32.xlu0 %v443_v26, %s1382_s25 }
  0x1f   : > { %947 = vrot.lane.b32.xlu1 %v447_v25, %s1383_s26  ;;  %945 = vrot.lane.b32.xlu0 %v443_v26, %s1383_s26 }
  0x23   : > { %625 = vrot.lane.b32.xlu1 %v622_v22, %s1384_s27  ;;  %623 = vrot.lane.b32.xlu0 %v618_v23, %s1384_s27 }
  0x27   : > { %715 = vrot.lane.b32.xlu1 %v447_v25, %s1385_s28  ;;  %713 = vrot.lane.b32.xlu0 %v443_v26, %s1385_s28 }
  0x2b   : > { %1110 = vrot.lane.b32.xlu1 %v622_v22, %s1386_s29  ;;  %1108 = vrot.lane.b32.xlu0 %v618_v23, %s1386_s29 }
  0x2f   : > { %1336 = vrot.lane.b32.xlu1 %v1380_v2, %s1385_s28  ;;  %1341 = vrot.lane.b32.xlu0 %v1380_v2, %s1387_s10 }
  0x33   : > { %1346 = vrot.lane.b32.xlu1 %v1380_v2, %s1384_s27  ;;  %1351 = vrot.lane.b32.xlu0 %v1380_v2, %s1386_s29 }
  0x37   : > { %1356 = vrot.lane.b32.xlu1 %v1380_v2, %s1388_s11 }
  0x86   : > { %v284_v27 = vpop.permute.xlu1 %283  ;;  %v268_v28 = vpop.permute.xlu0 %267 }
  0x87   : > { %v275_v29 = vmul.f32 %v268_v28, %v255_v5  ;;  %v276_v30 = vmul.f32 %v268_v28, %v256_v6 }
  0x89   : > { %v291_v32 = vadd.f32 %v284_v27, %v275_v29  ;;  %v292_v35 = vadd.f32 %v284_v27, %v276_v30  ;;  %v1272_v30 = vld [vmem:[%s1750_s5 + $0x10] sm:$0xf] }
  0x8a   : > { %v273_v31 = vpop.permute.xlu0 %272  ;;  %v289_v36 = vpop.permute.xlu1 %288 }
  0x8b   : > { %v277_v33 = vmul.f32 %v273_v31, %v257_v7  ;;  %v278_v34 = vmul.f32 %v273_v31, %v258_v10  ;;  %v296_v39 = vmax.f32 %v292_v35, 0.0  ;;  %v295_v41 = vmax.f32 %v291_v32, 0.0 }
  0x8d   : > { %v293_v37 = vadd.f32 %v289_v36, %v277_v33  ;;  %v294_v38 = vadd.f32 %v289_v36, %v278_v34 }
  0x8e   : > { %v317_v47 = vpop.permute.xlu1 %316  ;;  %v312_v48 = vpop.permute.xlu0 %311 }
  0x8f   : > { %v298_v40 = vmax.f32 %v294_v38, 0.0  ;;  %v297_v42 = vmax.f32 %v293_v37, 0.0 }
  0x91   : > { %v300_v43 = vpack.c.bf16 %v298_v40, %v296_v39  ;;  %v299_v44 = vpack.c.bf16 %v297_v42, %v295_v41 }
  0x92   : > { %v327_v49 = vpop.permute.xlu1 %326  ;;  %v322_v50 = vpop.permute.xlu0 %321 }
  0x93   : > { %346 = vmatprep.subr.bf16.mxu0 %v300_v43 }
  0x94   : > { %347 = vmatpush1.bf16.msra.mxu0 %v299_v44 }
  0x96   : > { %v1506_v51 = vpop.permute.xlu1 %859  ;;  %v1508_v52 = vpop.permute.xlu0 %857 }
  0x97   : > { %1263 = vmatmul.mubr.msk.bf16.vlgmr.msra.gmra.mrb[0].mxu0 %vm339_vm6, %v1370_v45  ;;  %vm862_vm10 = vcmp.ne.s16.totalorder %v1508_v52, 0  ;;  %v861_v31 = vsel %vm748_vm13, %v1508_v52, %v1506_v51 }
  0x98   : > { %388 = vmatprep.mubr.bf16.mxu0 %v1380_v2  ;;  %vm863_vm2 = vcmp.ne.s16.totalorder %v861_v31, 0 }
  0x9a   : > { %v1510_v53 = vpop.permute.xlu1 %450  ;;  %v449_v54 = vpop.permute.xlu0 %448 }
  0x9b   : > { %v1516_v4 = vsel %vm452_vm7, %v449_v54, %v1510_v53  ;;  %vm456_vm0 = vcmp.ne.s16.totalorder %v1510_v53, 0 }
  0x9c   : > { %vm455_vm9 = vcmp.ne.s16.totalorder %v1516_v4, 0 }
  0x9e   : > { %v948_v58 = vpop.permute.xlu1 %947  ;;  %v1512_v61 = vpop.permute.xlu0 %945 }
  0x9f   : > { %1264 = vmatmul.mubr.msk.bf16.gmra.mrb[4].mxu0 %vm339_vm6, %v1371_v46  ;;  %vm950_vm12 = vcmp.ne.s16.totalorder %v1512_v61, 0  ;;  %v949_v33 = vsel %vm658_vm14, %v1512_v61, %v948_v58 }
  0xa0   : > { %529 = vmatprep.mubr.bf16.mxu0 %v1380_v2  ;;  %vm951_vm3 = vcmp.ne.s16.totalorder %v949_v33, 0 }
  0xa2   : > { %v1520_v8 = vpop.permute.xlu1 %625  ;;  %v624_v11 = vpop.permute.xlu0 %623 }
  0xa3   : > { %v1529_v14 = vsel %vm627_vm8, %v624_v11, %v1520_v8  ;;  %vm631_vm1 = vcmp.ne.s16.totalorder %v1520_v8, 0 }
  0xa4   : > { %vm630_vm11 = vcmp.ne.s16.totalorder %v1529_v14, 0 }
  0xa6   : > { %v716_v43 = vpop.permute.xlu1 %715  ;;  %v714_v44 = vpop.permute.xlu0 %713 }
  0xa7   : > { %vm721_vm4 = vcmp.ne.s16.totalorder %v716_v43, 0 }
 0x16a   : > { %v380_v55 = vpop.f32.mrb[0].mxu0 }
 0x16b   : > { %v381_v56 = vadd.f32 %v380_v55, %v312_v48  ;;  %v382_v57 = vpop.f32.mrb[1].mxu0 }
 0x16c   : > { %v383_v59 = vadd.f32 %v382_v57, %v312_v48  ;;  %v384_v60 = vpop.f32.mrb[2].mxu0  ;;  %v1111_v48 = vpop.permute.xlu1 %1110 }
 0x16d   : > { %v385_v62 = vadd.f32 %v384_v60, %v317_v47  ;;  %v386_v63 = vpop.f32.mrb[3].mxu0  ;;  %v399_v1 = vmax.f32 %v381_v56, 0.0 }
 0x16e   : > { %v387_v0 = vadd.f32 %v386_v63, %v317_v47  ;;  %v400_v5 = vmax.f32 %v383_v59, 0.0  ;;  %v718_v47 = vsel %vm717_vm5, %v714_v44, %v716_v43 }
 0x16f   : > { %v401_v3 = vmax.f32 %v385_v62, 0.0 }
 0x170   : > { %v402_v6 = vmax.f32 %v387_v0, 0.0  ;;  %v1337_v59 = vpop.permute.xlu1 %1336 }
 0x171   : > { %v1518_v7 = vpack.c.bf16 %v401_v3, %v399_v1 }
 0x172   : > { %v1522_v9 = vpack.c.bf16 %v402_v6, %v400_v5  ;;  %v390_v10 = vpop.f32.mrb[4].mxu0 }
 0x173   : > { %v391_v12 = vadd.f32 %v390_v10, %v322_v50  ;;  %v392_v13 = vpop.f32.mrb[5].mxu0  ;;  %474 = vrot.lane.b32.xlu0 %v1518_v7, %s1387_s10  ;;  %v458_v20 = vsel %vm455_vm9, %v1518_v7, 0  ;;  %v865_v23 = vsel %vm862_vm10, %v1518_v7, 0  ;;  %v633_v28 = vsel %vm630_vm11, %v1518_v7, 0 }
 0x174   : > { %v393_v15 = vadd.f32 %v392_v13, %v322_v50  ;;  %v394_v16 = vpop.f32.mrb[6].mxu0  ;;  %476 = vrot.lane.b32.xlu1 %v1522_v9, %s1387_s10  ;;  %808 = vmatprep.subr.bf16.mxu1 %v1522_v9  ;;  %v953_v29 = vsel %vm950_vm12, %v1518_v7, 0  ;;  %v459_v32 = vsel %vm456_vm0, %v1522_v9, 0  ;;  %v866_v34 = vsel %vm863_vm2, %v1522_v9, 0  ;;  %v1658_v61 = vpop.permute.xlu1 %1346 }
 0x175   : > { %v395_v17 = vadd.f32 %v394_v16, %v327_v49  ;;  %v396_v18 = vpop.f32.mrb[7].mxu0  ;;  %809 = vmatpush1.bf16.msra.mxu1 %v1518_v7  ;;  %v403_v21 = vmax.f32 %v391_v12, 0.0  ;;  %v634_v35 = vsel %vm631_vm1, %v1522_v9, 0  ;;  %v954_v36 = vsel %vm951_vm3, %v1522_v9, 0 }
 0x176   : > { %v397_v19 = vadd.f32 %v396_v18, %v327_v49  ;;  %v404_v24 = vmax.f32 %v393_v15, 0.0  ;;  %v724_v46 = vsel %vm721_vm4, %v1522_v9, 0  ;;  %v1109_v49 = vpop.permute.xlu0 %1108  ;;  %v1338_v12 = vunpack.i.l.bf16 %v1337_v59 }
 0x177   : > { %v405_v22 = vmax.f32 %v395_v17, 0.0  ;;  %546 = vrot.lane.b32.xlu0 %v458_v20, %s1386_s29 }
 0x178   : > { %v406_v25 = vmax.f32 %v397_v19, 0.0  ;;  %879 = vrot.lane.b32.xlu1 %v865_v23, %s1385_s28  ;;  %v1660_v63 = vpop.permute.xlu1 %1356 }
 0x179   : > { %v1546_v26 = vpack.c.bf16 %v405_v22, %v403_v21 }
 0x17a   : > { %v1548_v27 = vpack.c.bf16 %v406_v25, %v404_v24  ;;  %v1342_v60 = vpop.permute.xlu0 %1341  ;;  %v1265_v25 = vld [vmem:[%s1750_s5 + $0x4] sm:$0xf] }
 0x17b   : > { %648 = vrot.lane.b32.xlu0 %v633_v28, %s1383_s26  ;;  %v868_v37 = vsel %vm862_vm10, %v1546_v26, 0  ;;  %v461_v38 = vsel %vm455_vm9, %v1546_v26, 0  ;;  %v956_v39 = vsel %vm950_vm12, %v1546_v26, 0  ;;  %v636_v42 = vsel %vm630_vm11, %v1546_v26, 0 }
 0x17c   : > { %967 = vrot.lane.b32.xlu1 %v953_v29, %s1384_s27  ;;  %810 = vmatprep.subr.bf16.mxu1 %v1548_v27  ;;  %v869_v40 = vsel %vm863_vm2, %v1548_v27, 0  ;;  %v462_v41 = vsel %vm456_vm0, %v1548_v27, 0  ;;  %v957_v45 = vsel %vm951_vm3, %v1548_v27, 0  ;;  %vm556_vm9 = vcmask 138240  }
 0x17d   : > { %811 = vmatpush1.bf16.msra.mxu1 %v1546_v26  ;;  %vm720_vm10 = vcmp.ne.s16.totalorder %v718_v47, 0  ;;  %v637_v50 = vsel %vm631_vm1, %v1548_v27, 0  ;;  %v1112_v51 = vsel %vm556_vm9, %v1109_v49, %v1111_v48  ;;  %vm1113_vm12 = vcmp.ne.s16.totalorder %v1109_v49, 0  ;;  %v463_v47 = vld [vmem:[%s1750_s5] sm:$0xf] }
 0x17e   : > { %v723_v52 = vsel %vm720_vm10, %v1518_v7, 0  ;;  %vm1114_vm11 = vcmp.ne.s16.totalorder %v1112_v51, 0  ;;  %v1116_v54 = vsel %vm1113_vm12, %v1518_v7, 0  ;;  %v727_v55 = vsel %vm721_vm4, %v1548_v27, 0  ;;  %v1352_v62 = vpop.permute.xlu0 %1351 }
 0x17f   : > { %1043 = vrot.lane.b32.xlu0 %v1522_v9, %s1388_s11  ;;  %v1117_v53 = vsel %vm1114_vm11, %v1522_v9, 0  ;;  %v726_v56 = vsel %vm720_vm10, %v1546_v26, 0  ;;  %v1120_v57 = vsel %vm1114_vm11, %v1548_v27, 0  ;;  %v1119_v58 = vsel %vm1113_vm12, %v1546_v26, 0 }
 0x180   : > { %548 = vrot.lane.b32.xlu1 %v459_v32, %s1386_s29  ;;  %1273 = vmatmul.mubr.msk.bf16.vlgmr.msra.gmra.mrb[0].mxu1 %vm493_vm15, %v1272_v30  ;;  %v1343_v1 = vunpack.i.l.bf16 %v1342_v60  ;;  %v1344_v19 = vunpack.i.h.bf16 %v1342_v60  ;;  %v1339_v30 = vunpack.i.h.bf16 %v1337_v59  ;;  %v1348_v32 = vunpack.i.l.bf16 %v1658_v61 }
 0x181   : > { %934 = vmatprep.mubr.bf16.mxu1 %v1380_v2  ;;  %v1349_v49 = vunpack.i.h.bf16 %v1658_v61  ;;  %v1359_v59 = vunpack.i.h.bf16 %v1660_v63 }
 0x183   : > { %881 = vrot.lane.b32.xlu0 %v866_v34, %s1385_s28 }
 0x184   : > { %650 = vrot.lane.b32.xlu1 %v634_v35, %s1383_s26 }
 0x187   : > { %969 = vrot.lane.b32.xlu0 %v954_v36, %s1384_s27 }
 0x188   : > { %482 = vrot.lane.b32.xlu1 %v1548_v27, %s1387_s10 }
 0x18b   : > { %480 = vrot.lane.b32.xlu0 %v1546_v26, %s1387_s10 }
 0x18c   : > { %885 = vrot.lane.b32.xlu1 %v868_v37, %s1385_s28  ;;  %v1274_v37 = vld [vmem:[%s1750_s5 + $0x14] sm:$0xf] }
 0x18f   : > { %552 = vrot.lane.b32.xlu0 %v461_v38, %s1386_s29 }
 0x190   : > { %973 = vrot.lane.b32.xlu1 %v956_v39, %s1384_s27  ;;  %v1354_v39 = vunpack.i.h.bf16 %v1352_v62 }
 0x193   : > { %887 = vrot.lane.b32.xlu0 %v869_v40, %s1385_s28 }
 0x194   : > { %1041 = vrot.lane.b32.xlu1 %v1518_v7, %s1388_s11 }
 0x197   : > { %1361 = vrot.lane.b32.xlu0 %v1380_v2, %s1383_s26 }
 0x198   : > { %554 = vrot.lane.b32.xlu1 %v462_v41, %s1386_s29 }
 0x19b   : > { %654 = vrot.lane.b32.xlu0 %v636_v42, %s1383_s26 }
 0x19c   : > { %1047 = vrot.lane.b32.xlu1 %v1546_v26, %s1388_s11  ;;  %v1353_v26 = vunpack.i.l.bf16 %v1352_v62 }
 0x19f   : > { %975 = vrot.lane.b32.xlu0 %v957_v45, %s1384_s27 }
 0x1a0   : > { %740 = vrot.lane.b32.xlu1 %v724_v46, %s1381_s24 }
 0x1a3   : > { %1049 = vrot.lane.b32.xlu0 %v1548_v27, %s1388_s11 }
 0x1a4   : > { %656 = vrot.lane.b32.xlu1 %v637_v50, %s1383_s26 }
 0x1a7   : > { %738 = vrot.lane.b32.xlu0 %v723_v52, %s1381_s24  ;;  %v1358_v52 = vunpack.i.l.bf16 %v1660_v63  ;;  %v1268_v63 = vld [vmem:[%s1750_s5 + $0x8] sm:$0xf] }
 0x1a8   : > { %1366 = vrot.lane.b32.xlu1 %v1380_v2, %s1382_s25 }
 0x1ab   : > { %1132 = vrot.lane.b32.xlu0 %v1117_v53, %s1382_s25 }
 0x1ac   : > { %1130 = vrot.lane.b32.xlu1 %v1116_v54, %s1382_s25 }
 0x1af   : > { %736 = vrot.lane.b32.xlu0 %v1380_v2, %s1381_s24 }
 0x1b0   : > { %746 = vrot.lane.b32.xlu1 %v727_v55, %s1381_s24 }
 0x1b3   : > { %744 = vrot.lane.b32.xlu0 %v726_v56, %s1381_s24 }
 0x1b4   : > { %742 = vrot.lane.b32.xlu1 %v1380_v2, %s1381_s24 }
 0x1b7   : > { %1138 = vrot.lane.b32.xlu0 %v1120_v57, %s1382_s25  ;;  %v1276_v57 = vld [vmem:[%s1750_s5 + $0x18] sm:$0xf] }
 0x1bb   : > { %1136 = vrot.lane.b32.xlu0 %v1119_v58, %s1382_s25 }
 0x1e5   : > { %v475_v0 = vpop.permute.xlu0 %474 }
 0x1e6   : > { %v477_v3 = vpop.permute.xlu1 %476  ;;  %v485_v5 = vsel %vm339_vm6, %v1343_v1, %v475_v0 }
 0x1e7   : > { %v486_v4 = vsel %vm339_vm6, %v475_v0, %v477_v3 }
 0x1e8   : > { %497 = vmatprep.subr.bf16.mxu0 %v486_v4 }
 0x1e9   : > { %498 = vmatpush1.bf16.msra.mxu0 %v485_v5  ;;  %v547_v6 = vpop.permute.xlu0 %546 }
 0x1ea   : > { %v880_v7 = vpop.permute.xlu1 %879  ;;  %v557_v29 = vsel %vm556_vm9, %v1353_v26, %v547_v6  ;;  %v1280_v26 = vld [vmem:[%s1750_s5 + $0x20] sm:$0xf] }
 0x1ed   : > { %v649_v8 = vpop.permute.xlu0 %648 }
 0x1ee   : > { %v968_v9 = vpop.permute.xlu1 %967 }
 0x1f1   : > { %v1664_v10 = vpop.permute.xlu0 %1043 }
 0x1f2   : > { %v549_v11 = vpop.permute.xlu1 %548 }
 0x1f3   : > { %v558_v24 = vsel %vm556_vm9, %v547_v6, %v549_v11 }
 0x1f5   : > { %v882_v13 = vpop.permute.xlu0 %881 }
 0x1f6   : > { %v891_v14 = vsel %vm717_vm5, %v880_v7, %v882_v13  ;;  %v651_v15 = vpop.permute.xlu1 %650  ;;  %v892_v16 = vsel %vm717_vm5, %v882_v13, %v1338_v12  ;;  %v1278_v12 = vld [vmem:[%s1750_s5 + $0x1c] sm:$0xf] }
 0x1f7   : > { %902 = vmatprep.subr.bf16.mxu1 %v892_v16  ;;  %v660_v46 = vsel %vm658_vm14, %v649_v8, %v651_v15 }
 0x1f8   : > { %903 = vmatpush1.bf16.msra.mxu1 %v891_v14 }
 0x1f9   : > { %v970_v17 = vpop.permute.xlu0 %969 }
 0x1fa   : > { %v483_v18 = vpop.permute.xlu1 %482  ;;  %v980_v36 = vsel %vm627_vm8, %v970_v17, %v1348_v32  ;;  %v979_v41 = vsel %vm627_vm8, %v968_v9, %v970_v17 }
 0x1fd   : > { %v481_v20 = vpop.permute.xlu0 %480 }
 0x1fe   : > { %v487_v21 = vsel %vm339_vm6, %v1344_v19, %v481_v20  ;;  %v886_v22 = vpop.permute.xlu1 %885  ;;  %v488_v23 = vsel %vm339_vm6, %v481_v20, %v483_v18  ;;  %vm1053_vm6 = vcmask 916480  }
 0x1ff   : > { %499 = vmatprep.subr.bf16.mxu0 %v488_v23  ;;  %v1055_v56 = vsel %vm1053_vm6, %v1664_v10, %v1358_v52 }
 0x200   : > { %500 = vmatpush1.bf16.msra.mxu0 %v487_v21 }
 0x201   : > { %568 = vmatprep.subr.bf16.mxu0 %v558_v24  ;;  %v553_v27 = vpop.permute.xlu0 %552 }
 0x202   : > { %v974_v28 = vpop.permute.xlu1 %973  ;;  %v559_v43 = vsel %vm556_vm9, %v1354_v39, %v553_v27 }
 0x203   : > { %1266 = vmatmul.mubr.msk.bf16.vlgmr.msra.gmra.mrb[8].mxu0 %vm493_vm15, %v1265_v25 }
 0x204   : > { %569 = vmatpush1.bf16.msra.mxu0 %v557_v29  ;;  %600 = vmatprep.mubr.bf16.mxu0 %v1380_v2 }
 0x205   : > { %v888_v31 = vpop.permute.xlu0 %887 }
 0x206   : > { %v893_v33 = vsel %vm717_vm5, %v886_v22, %v888_v31  ;;  %v1042_v34 = vpop.permute.xlu1 %1041  ;;  %v894_v35 = vsel %vm717_vm5, %v888_v31, %v1339_v30  ;;  %v1270_v22 = vld [vmem:[%s1750_s5 + $0xc] sm:$0xf] }
 0x207   : > { %904 = vmatprep.subr.bf16.mxu1 %v894_v35  ;;  %v1054_v62 = vsel %vm1053_vm6, %v1042_v34, %v1664_v10 }
 0x208   : > { %905 = vmatpush1.bf16.msra.mxu1 %v893_v33 }
 0x209   : > { %990 = vmatprep.subr.bf16.mxu1 %v980_v36  ;;  %v1362_v38 = vpop.permute.xlu0 %1361 }
 0x20a   : > { %v555_v40 = vpop.permute.xlu1 %554  ;;  %v1363_v44 = vunpack.i.l.bf16 %v1362_v38  ;;  %v1364_v60 = vunpack.i.h.bf16 %v1362_v38 }
 0x20b   : > { %1275 = vmatmul.mubr.msk.bf16.vlgmr.msra.gmra.mrb[0].mxu1 %vm493_vm15, %v1274_v37  ;;  %v560_v42 = vsel %vm556_vm9, %v553_v27, %v555_v40 }
 0x20c   : > { %570 = vmatprep.subr.bf16.mxu0 %v560_v42  ;;  %991 = vmatpush1.bf16.msra.mxu1 %v979_v41  ;;  %v659_v50 = vsel %vm658_vm14, %v1363_v44, %v649_v8 }
 0x20d   : > { %571 = vmatpush1.bf16.msra.mxu0 %v559_v43  ;;  %v655_v45 = vpop.permute.xlu0 %654  ;;  %1022 = vmatprep.mubr.bf16.mxu1 %v1380_v2 }
 0x20e   : > { %v1048_v48 = vpop.permute.xlu1 %1047  ;;  %670 = vmatprep.subr.bf16.mxu0 %v660_v46  ;;  %v661_v1 = vsel %vm658_vm14, %v1364_v60, %v655_v45 }
 0x210   : > { %1267 = vmatmul.mubr.msk.bf16.vlgmr.msra.gmra.mrb[8].mxu0 %vm493_vm15, %v463_v47 }
 0x211   : > { %v976_v51 = vpop.permute.xlu0 %975  ;;  %671 = vmatpush1.bf16.msra.mxu0 %v659_v50  ;;  %702 = vmatprep.mubr.bf16.mxu0 %v1380_v2 }
 0x212   : > { %v981_v53 = vsel %vm627_vm8, %v974_v28, %v976_v51  ;;  %v741_v54 = vpop.permute.xlu1 %740  ;;  %v982_v55 = vsel %vm627_vm8, %v976_v51, %v1349_v49 }
 0x213   : > { %992 = vmatprep.subr.bf16.mxu1 %v982_v55 }
 0x214   : > { %993 = vmatpush1.bf16.msra.mxu1 %v981_v53 }
 0x215   : > { %1065 = vmatprep.subr.bf16.mxu1 %v1055_v56  ;;  %v1050_v58 = vpop.permute.xlu0 %1049 }
 0x216   : > { %v657_v61 = vpop.permute.xlu1 %656  ;;  %v1057_v3 = vsel %vm1053_vm6, %v1050_v58, %v1359_v59  ;;  %v1056_v7 = vsel %vm1053_vm6, %v1048_v48, %v1050_v58 }
 0x217   : > { %1277 = vmatmul.mubr.msk.bf16.vlgmr.msra.gmra.mrb[0].mxu1 %vm493_vm15, %v1276_v57  ;;  %v662_v0 = vsel %vm658_vm14, %v655_v45, %v657_v61 }
 0x218   : > { %672 = vmatprep.subr.bf16.mxu0 %v662_v0  ;;  %1066 = vmatpush1.bf16.msra.mxu1 %v1054_v62 }
 0x219   : > { %1067 = vmatprep.subr.bf16.mxu1 %v1057_v3  ;;  %v739_v4 = vpop.permute.xlu0 %738  ;;  %673 = vmatpush1.bf16.msra.mxu0 %v661_v1 }
 0x21a   : > { %v1367_v5 = vpop.permute.xlu1 %1366  ;;  %v750_v6 = vsel %vm748_vm13, %v739_v4, %v741_v54  ;;  %1097 = vmatprep.mubr.bf16.mxu1 %v1380_v2 }
 0x21b   : > { %v1368_v8 = vunpack.i.l.bf16 %v1367_v5  ;;  %760 = vmatprep.subr.bf16.mxu0 %v750_v6  ;;  %v1369_v21 = vunpack.i.h.bf16 %v1367_v5 }
 0x21c   : > { %1068 = vmatpush1.bf16.msra.mxu1 %v1056_v7  ;;  %1269 = vmatmul.mubr.msk.bf16.vlgmr.msra.gmra.mrb[8].mxu0 %vm493_vm15, %v1268_v63 }
 0x21d   : > { %v1133_v9 = vpop.permute.xlu0 %1132  ;;  %792 = vmatprep.mubr.bf16.mxu0 %v1380_v2 }
 0x21e   : > { %v1131_v10 = vpop.permute.xlu1 %1130  ;;  %v1143_v11 = vsel %vm452_vm7, %v1133_v9, %v1368_v8 }
 0x21f   : > { %1153 = vmatprep.subr.bf16.mxu1 %v1143_v11  ;;  %v1142_v16 = vsel %vm452_vm7, %v1131_v10, %v1133_v9 }
 0x221   : > { %v737_v13 = vpop.permute.xlu0 %736 }
 0x222   : > { %v749_v14 = vsel %vm748_vm13, %v737_v13, %v739_v4  ;;  %v747_v15 = vpop.permute.xlu1 %746 }
 0x223   : > { %761 = vmatpush1.bf16.msra.mxu0 %v749_v14  ;;  %1279 = vmatmul.mubr.msk.bf16.vlgmr.msra.gmra.mrb[0].mxu1 %vm493_vm15, %v1278_v12 }
 0x224   : > { %1154 = vmatpush1.bf16.msra.mxu1 %v1142_v16  ;;  %1185 = vmatprep.mubr.bf16.mxu1 %v1380_v2 }
 0x225   : > { %v745_v17 = vpop.permute.xlu0 %744 }
 0x226   : > { %v743_v18 = vpop.permute.xlu1 %742  ;;  %v752_v19 = vsel %vm748_vm13, %v745_v17, %v747_v15 }
 0x227   : > { %v751_v20 = vsel %vm748_vm13, %v743_v18, %v745_v17  ;;  %762 = vmatprep.subr.bf16.mxu0 %v752_v19 }
 0x228   : > { %763 = vmatpush1.bf16.msra.mxu0 %v751_v20 }
 0x229   : > { %v1139_v23 = vpop.permute.xlu0 %1138 }
 0x22a   : > { %v1145_v24 = vsel %vm452_vm7, %v1139_v23, %v1369_v21 }
 0x22b   : > { %1271 = vmatmul.mubr.msk.bf16.vlgmr.msra.gmra.mrb[8].mxu0 %vm493_vm15, %v1270_v22  ;;  %1155 = vmatprep.subr.bf16.mxu1 %v1145_v24 }
 0x22d   : > { %v1137_v2 = vpop.permute.xlu0 %1136 }
 0x22e   : > { %v1144_v25 = vsel %vm452_vm7, %v1137_v2, %v1139_v23 }
 0x22f   : > { %1156 = vmatpush1.bf16.msra.mxu1 %v1144_v25 }
 0x232   : > { %1281 = vmatmul.mubr.msk.bf16.vlgmr.msra.gmra.mrb[0].mxu1 %vm493_vm15, %v1280_v26 }
 0x2fe   : > { %v794_v27 = vpop.f32.mrb[8].mxu0 }
 0x2ff   : > { %v796_v28 = vpop.f32.mrb[9].mxu0 }
 0x300   : > { %v798_v29 = vpop.f32.mrb[10].mxu0 }
 0x301   : > { %v799_v30 = vpop.f32.mrb[11].mxu0 }
 0x305   : > { %v1187_v31 = vpop.f32.mrb[0].mxu1 }
 0x306   : > { %v1285_v32 = vadd.f32 %v1187_v31, %v794_v27  ;;  %v1189_v33 = vpop.f32.mrb[1].mxu1 }
 0x307   : > { %v1286_v34 = vadd.f32 %v1189_v33, %v796_v28  ;;  %v1191_v35 = vpop.f32.mrb[2].mxu1 }
 0x308   : > { %1196 = vst [vmem:[%s1454_s14 + $0x20] sm:$0xff] %v1285_v32  ;;  %v1192_v36 = vpop.f32.mrb[3].mxu1 }
 0x309   : > { %1197 = vst [vmem:[%s1454_s14 + $0x28] sm:$0xff] %v1286_v34 }
 0x30a PF: > { %s16_s21 = sadd.s32 1, %s1378_s21  }
 0x30b   : > { %p13_p4 = scmp.ge.s32.totalorder %s16_s21, 4  }
 0x30d   :  { %15 = sbr.rel (!%p13_p4) target bundleno = 1 (0x1), region = 82 }

</bundles_post_ra>
